<compile_context>
chip_gen: v7x
topology: tpu7x:2x2x1
jax: 0.10.0
libtpu: 0.0.40
codegen_flags: <defaults>
</compile_context>

<pallas_src>
import functools

import jax
import jax.numpy as jnp
import numpy as np
from jax import lax
from jax.experimental import pallas as pl
from jax.experimental.pallas import tpu as pltpu


def _corr_kernel(x1_ref, x2_hbm, o_ref, win_ref, sem, *, D, W, tH, CC):
    """One grid step = one (batch b, row band h).

    x1_ref : (1, tH, C, W)        VMEM block of feature map 1 (row band)
    x2_hbm : (B, Hp, C, Wp)       zero-padded feature map 2, left in HBM
    o_ref  : (1, D, D, tH, W)     correlation output block, indexed [dy, dx, h, w]
    win_ref: (tH + D - 1, C, Wp)  VMEM scratch: x2 row window covering all dy
    sem    : DMA completion semaphore
    """
    b = pl.program_id(0)
    h = pl.program_id(1)
    C = x1_ref.shape[2]
    win_rows = tH + D - 1

    # Fetch the padded-x2 row window for this band once; it serves every dy
    # displacement (rows h*tH .. h*tH + tH + D - 2).
    row0 = h * tH
    cp = pltpu.make_async_copy(
        x2_hbm.at[b, pl.ds(row0, win_rows), :, :], win_ref, sem)
    cp.start()
    cp.wait()

    def dy_body(dy, carry):
        # Static channel-chunk loop keeps vreg live ranges bounded; the x1
        # chunk is loaded once per chunk and reused across all dx offsets.
        for c0 in range(0, C, CC):
            cw = min(CC, C - c0)
            a = x1_ref[0, :, c0:c0 + cw, :].astype(jnp.float32)      # (tH, cw, W)
            for dx in range(D):                                      # static lane offsets
                w2 = win_ref[pl.ds(dy, tH), c0:c0 + cw, dx:dx + W].astype(jnp.float32)
                part = jnp.sum(a * w2, axis=1)                       # (tH, W) f32
                if c0 == 0:
                    o_ref[0, dy, dx, :, :] = part
                else:
                    o_ref[0, dy, dx, :, :] = o_ref[0, dy, dx, :, :] + part
        return carry

    lax.fori_loop(0, D, dy_body, 0)


def _pick_band(H, D, C, W, Wp, itemsize):
    """Row-band height: divides H, multiple of 8 (sublane tile) when < H, and
    keeps the per-step VMEM working set well under the 32 MiB scoped limit."""
    budget = 20 * 1024 * 1024
    cands = [t for t in (64, 48, 40, 32, 24, 16, 8) if t <= H and H % t == 0]
    for t in cands:
        need = (2 * D * D * t * W * 4                 # output block (f32), 2 buffers
                + 2 * t * C * W * itemsize            # x1 block, 2 buffers
                + (t + D - 1) * C * Wp * itemsize)    # x2 row-window scratch
        if need <= budget:
            return t
    if cands:
        return cands[-1]
    return H   # block == full dim is always a legal block shape


def correlation_layer(x_1, x_2, img, p_1, p_2, *, padding=20,
                      train_mode=True, refine_mode=False):
    pad = padding
    D = 2 * pad + 1

    x1, x2 = x_1, x_2
    if train_mode:
        x1 = jnp.concatenate([x1, p_1], axis=1)
        x2 = jnp.concatenate([x2, p_2], axis=1)
    if refine_mode:
        x1 = jnp.concatenate([x1, p_1], axis=1)
        x2 = jnp.concatenate([x2, p_2], axis=1)

    B, C, H, W = x1.shape
    Ci = img.shape[1]
    Hp, Wp = H + 2 * pad, W + 2 * pad
    itemsize = jnp.dtype(x1.dtype).itemsize

    # Zero spatial padding of x2, then (B, H, C, W) kernel layout: W on lanes,
    # C on sublanes, the dy-offset row index on a major (untiled) dim.
    x2p = jnp.pad(x2, ((0, 0), (0, 0), (pad, pad), (pad, pad)))
    x1_k = jnp.transpose(x1, (0, 2, 1, 3))    # (B, H,  C, W)
    x2_k = jnp.transpose(x2p, (0, 2, 1, 3))   # (B, Hp, C, Wp)

    tH = _pick_band(H, D, C, W, Wp, itemsize)
    nH = H // tH

    # Channel-chunk width: ~16 vregs per operand, multiple of 8 when possible.
    cc = min(C, max(1, (16 * 1024) // (tH * W)))
    if C >= 8:
        cc = min(C, max(8, (cc // 8) * 8))

    kernel = functools.partial(_corr_kernel, D=D, W=W, tH=tH, CC=cc)

    flops = 2 * B * D * D * H * W * C
    bytes_accessed = (int(x1_k.size) * itemsize
                      + B * nH * (tH + D - 1) * C * Wp * itemsize
                      + B * D * D * H * W * 4)

    vb = pl.pallas_call(
        kernel,
        grid=(B, nH),
        in_specs=[
            pl.BlockSpec((1, tH, C, W), lambda b, h: (b, h, 0, 0)),
            pl.BlockSpec(memory_space=pl.ANY),      # padded x2 stays in HBM
        ],
        out_specs=pl.BlockSpec((1, D, D, tH, W), lambda b, h: (b, 0, 0, h, 0)),
        out_shape=jax.ShapeDtypeStruct((B, D, D, H, W), jnp.float32),
        scratch_shapes=[
            pltpu.VMEM((tH + D - 1, C, Wp), x2_k.dtype),
            pltpu.SemaphoreType.DMA(()),
        ],
        compiler_params=pltpu.CompilerParams(
            dimension_semantics=("parallel", "parallel"),
            vmem_limit_bytes=32 * 1024 * 1024,
        ),
        cost_estimate=pl.CostEstimate(
            flops=flops, transcendentals=0, bytes_accessed=bytes_accessed),
    )(x1_k, x2_k)

    out_vb = vb.reshape(B, D * D, H, W)       # channel = dy*D + dx (free reshape)

    # out_img is D*D shifted crops of the padded image: pure data replication,
    # built from static slices (plain strided copies), no gathers / 6-D transpose.
    imgp = jnp.pad(img, ((0, 0), (0, 0), (pad, pad), (pad, pad)))
    crops = []
    for dy in range(D):
        row = lax.slice_in_dim(imgp, dy, dy + H, axis=2)           # (B, Ci, H, Wp)
        for dx in range(D):
            crops.append(lax.slice_in_dim(row, dx, dx + W, axis=3))  # (B, Ci, H, W)
    out_img = jnp.stack(crops, axis=1).reshape(B, D * D * Ci, H, W)

    return out_vb, out_img


def correlation_ref(x_1, x_2, img, p_1, p_2, pad, train_mode=True, refine_mode=False):
    """Pure-JAX reference mirroring the PyTorch loop exactly."""
    x1 = jnp.transpose(x_1, (0, 2, 3, 1))
    x2 = jnp.transpose(jnp.pad(x_2, ((0, 0), (0, 0), (pad, pad), (pad, pad))), (0, 2, 3, 1))
    imgp = jnp.pad(img, ((0, 0), (0, 0), (pad, pad), (pad, pad)))
    p1 = jnp.transpose(p_1, (0, 2, 3, 1))
    p2 = jnp.transpose(jnp.pad(p_2, ((0, 0), (0, 0), (pad, pad), (pad, pad))), (0, 2, 3, 1))
    if train_mode:
        x1 = jnp.concatenate([x1, p1], axis=3)
        x2 = jnp.concatenate([x2, p2], axis=3)
    if refine_mode:
        x1 = jnp.concatenate([x1, p1], axis=3)
        x2 = jnp.concatenate([x2, p2], axis=3)
    H, W = x1.shape[1], x1.shape[2]
    D = 2 * pad + 1
    vbs, imgs = [], []
    for dy in range(D):
        for dx in range(D):
            c = jnp.sum(x1 * x2[:, dy:dy + H, dx:dx + W, :], axis=3, keepdims=True)
            vbs.append(jnp.transpose(c, (0, 3, 1, 2)))
            imgs.append(imgp[:, :, dy:dy + H, dx:dx + W])
    return jnp.concatenate(vbs, axis=1), jnp.concatenate(imgs, axis=1)


if __name__ == "__main__":
    key = jax.random.PRNGKey(0)
    k1, k2, k3, k4, k5 = jax.random.split(key, 5)

    B, C, Cp, Ci, H, W = 2, 4, 2, 3, 8, 8
    pad = 2  # small padding for the synthetic test (module default is 20)

    x_1 = jax.random.normal(k1, (B, C, H, W), dtype=jnp.float32)
    x_2 = jax.random.normal(k2, (B, C, H, W), dtype=jnp.float32)
    img = jax.random.normal(k3, (B, Ci, H, W), dtype=jnp.float32)
    p_1 = jax.random.normal(k4, (B, Cp, H, W), dtype=jnp.float32)
    p_2 = jax.random.normal(k5, (B, Cp, H, W), dtype=jnp.float32)

    out_vb, out_img = correlation_layer(x_1, x_2, img, p_1, p_2,
                                        padding=pad, train_mode=True, refine_mode=False)
    jax.block_until_ready((out_vb, out_img))

    ref_vb, ref_img = correlation_ref(x_1, x_2, img, p_1, p_2, pad,
                                      train_mode=True, refine_mode=False)

    D = 2 * pad + 1
    assert out_vb.shape == (B, D * D, H, W), out_vb.shape
    assert out_img.shape == (B, D * D * Ci, H, W), out_img.shape
    np.testing.assert_allclose(np.asarray(out_vb), np.asarray(ref_vb), rtol=1e-5, atol=1e-5)
    np.testing.assert_allclose(np.asarray(out_img), np.asarray(ref_img), rtol=1e-5, atol=1e-5)

    print("KERNEL_OK")
</pallas_src>

<mosaic_0001>
module attributes {stable_mosaic.version = 11 : i64} {
  func.func @_corr_kernel(%arg0: i32, %arg1: i32, %arg2: memref<1x8x6x8xf32, #tpu.memory_space<vmem>>, %arg3: memref<2x12x6x12xf32, #tpu.memory_space<any>>, %arg4: memref<1x5x5x8x8xf32, #tpu.memory_space<vmem>>, %arg5: memref<12x6x12xf32, #tpu.memory_space<vmem>>, %arg6: memref<!tpu.dma_semaphore, #tpu.memory_space<semaphore_mem>>) attributes {dimension_semantics = [#tpu.dimension_semantics<parallel>, #tpu.dimension_semantics<parallel>], iteration_bounds = array<i64: 2, 1>, scalar_prefetch = 0 : i64, scratch_operands = 2 : i64, tpu.core_type = #tpu.core_type<tc>, window_params = [{transform_indices = @transform_0, window_bounds = array<i64: 1, 8, 6, 8>}, {}, {transform_indices = @transform_2, window_bounds = array<i64: 1, 5, 5, 8, 8>}]} {
    %c8_i32 = arith.constant 8 : i32
    %0 = arith.muli %arg1, %c8_i32 : i32
    %c0_i32 = arith.constant 0 : i32
    %c0_i32_0 = arith.constant 0 : i32
    %1 = tpu.memref_slice %arg3[%arg0, %0, %c0_i32, %c0_i32_0] : memref<2x12x6x12xf32, #tpu.memory_space<any>> -> memref<1x12x6x12xf32, #tpu.memory_space<any>>
    %2 = tpu.memref_squeeze %1 : memref<1x12x6x12xf32, #tpu.memory_space<any>> -> memref<12x6x12xf32, #tpu.memory_space<any>>
    tpu.enqueue_dma source(%2 : memref<12x6x12xf32, #tpu.memory_space<any>>) target(%arg5 : memref<12x6x12xf32, #tpu.memory_space<vmem>>) target_semaphore(%arg6 : memref<!tpu.dma_semaphore, #tpu.memory_space<semaphore_mem>>)
    %c0_i32_1 = arith.constant 0 : i32
    %c0_i32_2 = arith.constant 0 : i32
    %3 = tpu.memref_slice %arg3[%arg0, %0, %c0_i32_1, %c0_i32_2] : memref<2x12x6x12xf32, #tpu.memory_space<any>> -> memref<1x12x6x12xf32, #tpu.memory_space<any>>
    %4 = tpu.memref_squeeze %3 : memref<1x12x6x12xf32, #tpu.memory_space<any>> -> memref<12x6x12xf32, #tpu.memory_space<any>>
    tpu.wait_dma2 semaphore(%arg6 : memref<!tpu.dma_semaphore, #tpu.memory_space<semaphore_mem>>) src(%4 : memref<12x6x12xf32, #tpu.memory_space<any>>) dst(%arg5 : memref<12x6x12xf32, #tpu.memory_space<vmem>>)
    %c0_i32_3 = arith.constant 0 : i32
    %c5_i32 = arith.constant 5 : i32
    %5 = arith.addi %c0_i32_3, %c5_i32 : i32
    %c1_i32 = arith.constant 1 : i32
    scf.for %arg7 = %c0_i32_3 to %5 step %c1_i32  : i32 {
      %c0 = arith.constant 0 : index
      %c0_5 = arith.constant 0 : index
      %c0_6 = arith.constant 0 : index
      %c0_7 = arith.constant 0 : index
      %6 = vector.load %arg2[%c0, %c0_5, %c0_6, %c0_7] : memref<1x8x6x8xf32, #tpu.memory_space<vmem>>, vector<1x8x6x8xf32>
      %7 = vector.shape_cast %6 : vector<1x8x6x8xf32> to vector<8x6x8xf32>
      %8 = arith.index_cast %arg7 : i32 to index
      %c0_8 = arith.constant 0 : index
      %c0_9 = arith.constant 0 : index
      %9 = vector.load %arg5[%8, %c0_8, %c0_9] : memref<12x6x12xf32, #tpu.memory_space<vmem>>, vector<8x6x8xf32>
      %10 = arith.mulf %7, %9 : vector<8x6x8xf32>
      %cst = arith.constant dense<0.000000e+00> : vector<8x8xf32>
      %11 = vector.multi_reduction <add>, %10, %cst [1] : vector<8x6x8xf32> to vector<8x8xf32>
      %c0_10 = arith.constant 0 : index
      %12 = arith.index_cast %arg7 : i32 to index
      %c0_11 = arith.constant 0 : index
      %c0_12 = arith.constant 0 : index
      %c0_13 = arith.constant 0 : index
      %13 = vector.load %arg4[%c0_10, %12, %c0_11, %c0_12, %c0_13] : memref<1x5x5x8x8xf32, #tpu.memory_space<vmem>>, vector<1x1x1x8x8xf32>
      %14 = vector.shape_cast %13 : vector<1x1x1x8x8xf32> to vector<8x8xf32>
      %15 = vector.shape_cast %11 : vector<8x8xf32> to vector<1x1x1x8x8xf32>
      tpu.vector_store %arg4[%c0_10, %12, %c0_11, %c0_12, %c0_13], %15 {strides = array<i32>} : memref<1x5x5x8x8xf32, #tpu.memory_space<vmem>>, vector<1x1x1x8x8xf32>,
      %16 = arith.index_cast %arg7 : i32 to index
      %c0_14 = arith.constant 0 : index
      %c1 = arith.constant 1 : index
      %17 = vector.load %arg5[%16, %c0_14, %c1] : memref<12x6x12xf32, #tpu.memory_space<vmem>>, vector<8x6x8xf32>
      %18 = arith.mulf %7, %17 : vector<8x6x8xf32>
      %cst_15 = arith.constant dense<0.000000e+00> : vector<8x8xf32>
      %19 = vector.multi_reduction <add>, %18, %cst_15 [1] : vector<8x6x8xf32> to vector<8x8xf32>
      %c0_16 = arith.constant 0 : index
      %20 = arith.index_cast %arg7 : i32 to index
      %c1_17 = arith.constant 1 : index
      %c0_18 = arith.constant 0 : index
      %c0_19 = arith.constant 0 : index
      %21 = vector.load %arg4[%c0_16, %20, %c1_17, %c0_18, %c0_19] : memref<1x5x5x8x8xf32, #tpu.memory_space<vmem>>, vector<1x1x1x8x8xf32>
      %22 = vector.shape_cast %21 : vector<1x1x1x8x8xf32> to vector<8x8xf32>
      %23 = vector.shape_cast %19 : vector<8x8xf32> to vector<1x1x1x8x8xf32>
      tpu.vector_store %arg4[%c0_16, %20, %c1_17, %c0_18, %c0_19], %23 {strides = array<i32>} : memref<1x5x5x8x8xf32, #tpu.memory_space<vmem>>, vector<1x1x1x8x8xf32>,
      %24 = arith.index_cast %arg7 : i32 to index
      %c0_20 = arith.constant 0 : index
      %c2 = arith.constant 2 : index
      %25 = vector.load %arg5[%24, %c0_20, %c2] : memref<12x6x12xf32, #tpu.memory_space<vmem>>, vector<8x6x8xf32>
      %26 = arith.mulf %7, %25 : vector<8x6x8xf32>
      %cst_21 = arith.constant dense<0.000000e+00> : vector<8x8xf32>
      %27 = vector.multi_reduction <add>, %26, %cst_21 [1] : vector<8x6x8xf32> to vector<8x8xf32>
      %c0_22 = arith.constant 0 : index
      %28 = arith.index_cast %arg7 : i32 to index
      %c2_23 = arith.constant 2 : index
      %c0_24 = arith.constant 0 : index
      %c0_25 = arith.constant 0 : index
      %29 = vector.load %arg4[%c0_22, %28, %c2_23, %c0_24, %c0_25] : memref<1x5x5x8x8xf32, #tpu.memory_space<vmem>>, vector<1x1x1x8x8xf32>
      %30 = vector.shape_cast %29 : vector<1x1x1x8x8xf32> to vector<8x8xf32>
      %31 = vector.shape_cast %27 : vector<8x8xf32> to vector<1x1x1x8x8xf32>
      tpu.vector_store %arg4[%c0_22, %28, %c2_23, %c0_24, %c0_25], %31 {strides = array<i32>} : memref<1x5x5x8x8xf32, #tpu.memory_space<vmem>>, vector<1x1x1x8x8xf32>,
      %32 = arith.index_cast %arg7 : i32 to index
      %c0_26 = arith.constant 0 : index
      %c3 = arith.constant 3 : index
      %33 = vector.load %arg5[%32, %c0_26, %c3] : memref<12x6x12xf32, #tpu.memory_space<vmem>>, vector<8x6x8xf32>
      %34 = arith.mulf %7, %33 : vector<8x6x8xf32>
      %cst_27 = arith.constant dense<0.000000e+00> : vector<8x8xf32>
      %35 = vector.multi_reduction <add>, %34, %cst_27 [1] : vector<8x6x8xf32> to vector<8x8xf32>
      %c0_28 = arith.constant 0 : index
      %36 = arith.index_cast %arg7 : i32 to index
      %c3_29 = arith.constant 3 : index
      %c0_30 = arith.constant 0 : index
      %c0_31 = arith.constant 0 : index
      %37 = vector.load %arg4[%c0_28, %36, %c3_29, %c0_30, %c0_31] : memref<1x5x5x8x8xf32, #tpu.memory_space<vmem>>, vector<1x1x1x8x8xf32>
      %38 = vector.shape_cast %37 : vector<1x1x1x8x8xf32> to vector<8x8xf32>
      %39 = vector.shape_cast %35 : vector<8x8xf32> to vector<1x1x1x8x8xf32>
      tpu.vector_store %arg4[%c0_28, %36, %c3_29, %c0_30, %c0_31], %39 {strides = array<i32>} : memref<1x5x5x8x8xf32, #tpu.memory_space<vmem>>, vector<1x1x1x8x8xf32>,
      %40 = arith.index_cast %arg7 : i32 to index
      %c0_32 = arith.constant 0 : index
      %c4 = arith.constant 4 : index
      %41 = vector.load %arg5[%40, %c0_32, %c4] : memref<12x6x12xf32, #tpu.memory_space<vmem>>, vector<8x6x8xf32>
      %42 = arith.mulf %7, %41 : vector<8x6x8xf32>
      %cst_33 = arith.constant dense<0.000000e+00> : vector<8x8xf32>
      %43 = vector.multi_reduction <add>, %42, %cst_33 [1] : vector<8x6x8xf32> to vector<8x8xf32>
      %c0_34 = arith.constant 0 : index
      %44 = arith.index_cast %arg7 : i32 to index
      %c4_35 = arith.constant 4 : index
      %c0_36 = arith.constant 0 : index
      %c0_37 = arith.constant 0 : index
      %45 = vector.load %arg4[%c0_34, %44, %c4_35, %c0_36, %c0_37] : memref<1x5x5x8x8xf32, #tpu.memory_space<vmem>>, vector<1x1x1x8x8xf32>
      %46 = vector.shape_cast %45 : vector<1x1x1x8x8xf32> to vector<8x8xf32>
      %47 = vector.shape_cast %43 : vector<8x8xf32> to vector<1x1x1x8x8xf32>
      tpu.vector_store %arg4[%c0_34, %44, %c4_35, %c0_36, %c0_37], %47 {strides = array<i32>} : memref<1x5x5x8x8xf32, #tpu.memory_space<vmem>>, vector<1x1x1x8x8xf32>,
    }
    %c5_i32_4 = arith.constant 5 : i32
    return
  }
  func.func @transform_0(%arg0: i32, %arg1: i32) -> (i32, i32, i32, i32) {
    %c0_i32 = arith.constant 0 : i32
    %c0_i32_0 = arith.constant 0 : i32
    %c0_i32_1 = arith.constant 0 : i32
    return %arg0, %arg1, %c0_i32, %c0_i32_0 : i32, i32, i32, i32
  }
  func.func @transform_2(%arg0: i32, %arg1: i32) -> (i32, i32, i32, i32, i32) {
    %c0_i32 = arith.constant 0 : i32
    %c0_i32_0 = arith.constant 0 : i32
    %c0_i32_1 = arith.constant 0 : i32
    %c0_i32_2 = arith.constant 0 : i32
    return %arg0, %c0_i32, %c0_i32_0, %arg1, %c0_i32_1 : i32, i32, i32, i32, i32
  }
}

</mosaic_0001>

<bundles_post_ra>
// kernel: tpu_custom_call.1
= control target key start
LH: loop header
LB: loop body
LE: loop exit
PB: predicated region body
PF: predicated region fallthrough
CT: control target
= control target key end

     0   :  { %7 = vsyncpa [#allocation5], 0  ;;  %s1583_s0 = inlined_call_operand.vmem [shape: f32[2,8,6,8], index: 0, kind: input, shape index: {}]   ;;  %s1584_s1 = inlined_call_operand.vmem [shape: f32[2,12,6,12], index: 1, kind: input, shape index: {}]   ;;  %s1585_s2 = inlined_call_operand.hbm [shape: f32[2,5,5,8,8], index: 2, kind: output, shape index: {}]  }
   0x1   :  { %9 = vsyncpa [#allocation5 + $0x1], 0  ;;  %s1197_s9 = smov 0   ;;  %s1199_s10 = smov 0  }
   0x2   :  { %s1201_s11 = smov 0   ;;  %s1203_s12 = smov 0  }
   0x3   :  { %s1205_s13 = smov 0   ;;  %s1207_s14 = smov 0  }
   0x4 LB: > { %s997_s15 = sadd.s32 4294967295, %s1169_s14   ;;  %s998_s16 = sadd.s32 4294967294, %s1169_s14   ;;  %s1169_s14 = sphi %s1207_s14, %s15_s14   ;;  %s1165_s13 = sphi %s1205_s13, %s1592_s13   ;;  %s1161_s12 = sphi %s1203_s12, %s1591_s12   ;;  %s1157_s11 = sphi %s1201_s11, %s1590_s11   ;;  %s1153_s10 = sphi %s1199_s10, %s1589_s10   ;;  %s1149_s9 = sphi %s1197_s9, %s1588_s9  }
   0x5   : > { %s27_s17 = sadd.s32 1, %s1165_s13  ;;  %s64_s18 = sadd.s32 1, %s1157_s11 }
   0x6   : > { %p29_p0 = scmp.ge.s32.totalorder %s27_s17, 2  ;;  %p74_p1 = scmp.ne.s32.totalorder %s1157_s11, %s1153_s10 }
   0x7   : > { %p75_p2 = scmp.eq.s32.totalorder %s997_s15, 1  ;;  %p80_p3 = scmp.ne.s32.totalorder %s1153_s10, %s1149_s9 }
   0x8   : > { %s1594_s17 = smov (%p29_p0, %s27_s17), 0  ;;  %p81_p5 = scmp.eq.s32.totalorder %s998_s16, 1 }
   0x9   : > { %p1237_p4 = por %p75_p2, %p74_p1  ;;  %s59_s20 = ssub.s32 %s1165_s13, %s1594_s17 }
   0xa   : > { %p1001_p6 = scmp.ge.s32.totalorder %s1169_s14, 1  ;;  %p62_p7 = scmp.eq.s32.totalorder %s59_s20, 0 }
   0xb   : > { %p1244_p8 = por %p81_p5, %p80_p3  ;;  %p112_p9 = scmp.lt.s32.totalorder %s1169_s14, 3 }
   0xc   : > { %s1250_s22 = scalar_select %p62_p7, %s1157_s11, %s64_s18  }
   0xd   : > { %p113_p10 = pnand %p1001_p6, %p112_p9 }
   0xe   : > { %s133_s23 = sand.u32 (!%p113_p10), 1, %s1153_s10   ;;  %p137_p11 = scmp.lt.s32.totalorder (!%p113_p10), %s1161_s12, 1 }
   0xf   : > { %116 = sbr.rel (%p113_p10) target bundleno = 246 (0xf6), region = 24 }
  0x10   : > { %s1256_s24 = smul.u32 (!%p113_p10), 200, %s133_s23 }
  0x11   : > { %s148_s26 = smul.u32 (!%p113_p10), 96, %s1161_s12 }
  0x12   : > { %s135_s6 = scalar_lea.vmem (!%p113_p10), [#allocation4], %s1256_s24 }
  0x13   : > { %s150_s5 = scalar_lea.vmem (!%p113_p10), %s1584_s1, %s148_s26 }
  0x14   : > { %v168_v0 = vld [vmem:[%s150_s5] sm:$0x3f] (!%p113_p10)  ;;  %v170_v1 = vld [vmem:[%s150_s5 + $0x8] sm:$0x3f] (!%p113_p10)  ;;  %v172_v2 = vld [vmem:[%s150_s5 + $0x10] sm:$0x3f] (!%p113_p10) }
  0x15   : > { %169 = vst [vmem:[#allocation2] sm:$0x3f] (!%p113_p10), %v168_v0  ;;  %171 = vst [vmem:[#allocation2 + $0x8] sm:$0x3f] (!%p113_p10), %v170_v1  ;;  %v174_v3 = vld [vmem:[%s150_s5 + $0x18] sm:$0x3f] (!%p113_p10) }
  0x16   : > { %s138_s25 = scalar_select %p137_p11, %s1161_s12, 1  ;;  %173 = vst [vmem:[#allocation2 + $0x10] sm:$0x3f] %v172_v2  ;;  %v176_v4 = vld [vmem:[%s150_s5 + $0x20] sm:$0x3f] }
  0x17   : > { %v178_v5 = vld [vmem:[%s150_s5 + $0x28] sm:$0x3f]  ;;  %175 = vst [vmem:[#allocation2 + $0x18] sm:$0x3f] %v174_v3  ;;  %177 = vst [vmem:[#allocation2 + $0x20] sm:$0x3f] %v176_v4 }
  0x18   : > { %s1013_s27 = sshll.u32 %s138_s25, 6  ;;  %179 = vst [vmem:[#allocation2 + $0x28] sm:$0x3f] %v178_v5  ;;  %v180_v6 = vld [vmem:[%s150_s5 + $0x30] sm:$0x3f] }
  0x19   : > { %s1263_s30 = scalar_lea.vmem %s1583_s0, %s1013_s27  ;;  %v182_v7 = vld [vmem:[%s150_s5 + $0x38] sm:$0x3f]  ;;  %v184_v8 = vld [vmem:[%s150_s5 + $0x40] sm:$0x3f]  ;;  %181 = vst [vmem:[#allocation2 + $0x30] sm:$0x3f] %v180_v6 }
  0x1a   : > { %183 = vst [vmem:[#allocation2 + $0x38] sm:$0x3f] %v182_v7  ;;  %185 = vst [vmem:[#allocation2 + $0x40] sm:$0x3f] %v184_v8  ;;  %v186_v9 = vld [vmem:[%s150_s5 + $0x48] sm:$0x3f] }
  0x1b   : > { %v188_v10 = vld [vmem:[%s150_s5 + $0x50] sm:$0x3f]  ;;  %v190_v11 = vld [vmem:[%s150_s5 + $0x58] sm:$0x3f]  ;;  %187 = vst [vmem:[#allocation2 + $0x48] sm:$0x3f] %v186_v9 }
  0x1c   : > { %189 = vst [vmem:[#allocation2 + $0x50] sm:$0x3f] %v188_v10  ;;  %191 = vst [vmem:[#allocation2 + $0x58] sm:$0x3f] %v190_v11 }
  0x1d   : > { %246 = vsyncadd [#allocation3], 1152 }
  0x1e   : > { %1141 = dma.done.wait [#allocation3], 1152 }
  0x1f   : > { %1142 = vsyncadd [#allocation3], 4294966144  ;;  %s1269_s7 = smov 0  }
  0x20 LB: >> { %s1004_s8 = sshll.u32 %s1173_s7, 3  ;;  %s1175_s16 = smov 126   ;;  %v1304_v26 = vld [vmem:[%s1263_s30] sm:$0x3f]  ;;  %v1307_v27 = vld [vmem:[%s1263_s30 + $0x8] sm:$0x3f]  ;;  %s1173_s7 = sphi %s1269_s7, %s256_s7  }
  0x21   : >> { %s1275_s15 = scalar_lea.vmem [#allocation2], %s1004_s8  ;;  %s1176_s18 = smov 127   ;;  %v1315_v33 = vld [vmem:[%s1263_s30 + $0x10] sm:$0x3f]  ;;  %vm283_vm0 = vcmask 62464   ;;  %vm348_vm1 = vcmask 1041409  }
  0x22   : >> { %s1177_s20 = smov 125   ;;  %s1178_s25 = smov 124   ;;  %v1326_v40 = vld [vmem:[%s1263_s30 + $0x18] sm:$0x3f]  ;;  %v1338_v51 = vld [vmem:[%s1263_s30 + $0x20] sm:$0x3f] }
  0x23   : >> { %v490_v12 = vld [vmem:[%s1275_s15] sm:$0x3f]  ;;  %v491_v14 = vld [vmem:[%s1275_s15 + $0x8] sm:$0x3f]  ;;  %v492_v20 = vld [vmem:[%s1275_s15 + $0x10] sm:$0x3f] }
  0x24   : >> { %v367_v13 = vld [vmem:[%s1275_s15] sm:$0x3f]  ;;  %506 = vrot.lane.b32.xlu1 %v490_v12, %s1175_s16  ;;  %v368_v15 = vld [vmem:[%s1275_s15 + $0x8] sm:$0x3f]  ;;  %v369_v21 = vld [vmem:[%s1275_s15 + $0x10] sm:$0x3f] }
  0x25   : >> { %383 = vrot.lane.b32.xlu0 %v367_v13, %s1176_s18  ;;  %v614_v16 = vld [vmem:[%s1275_s15 + $0x8] sm:$0x3f]  ;;  %v613_v17 = vld [vmem:[%s1275_s15] sm:$0x3f]  ;;  %v738_v22 = vld [vmem:[%s1275_s15 + $0x10] sm:$0x3f] }
  0x26   : >> { %v737_v18 = vld [vmem:[%s1275_s15 + $0x8] sm:$0x3f]  ;;  %v736_v19 = vld [vmem:[%s1275_s15] sm:$0x3f]  ;;  %v615_v23 = vld [vmem:[%s1275_s15 + $0x10] sm:$0x3f] }
  0x27   : >> { %v267_v24 = vld [vmem:[%s1275_s15] sm:$0x3f]  ;;  %v268_v25 = vld [vmem:[%s1275_s15 + $0x8] sm:$0x3f]  ;;  %v493_v28 = vld [vmem:[%s1275_s15 + $0x18] sm:$0x3f] }
  0x28   : >> { %508 = vrot.lane.b32.xlu1 %v491_v14, %s1175_s16  ;;  %v370_v29 = vld [vmem:[%s1275_s15 + $0x18] sm:$0x3f]  ;;  %v275_v30 = vmul.f32 %v267_v24, %v1304_v26  ;;  %v276_v31 = vmul.f32 %v268_v25, %v1307_v27  ;;  %v269_v32 = vld [vmem:[%s1275_s15 + $0x10] sm:$0x3f]  ;;  %v494_v45 = vld [vmem:[%s1275_s15 + $0x20] sm:$0x3f] }
  0x29   : >> { %385 = vrot.lane.b32.xlu0 %v368_v15, %s1176_s18  ;;  %v277_v34 = vmul.f32 %v269_v32, %v1315_v33  ;;  %v270_v35 = vld [vmem:[%s1275_s15 + $0x18] sm:$0x3f]  ;;  %v371_v46 = vld [vmem:[%s1275_s15 + $0x20] sm:$0x3f]  ;;  %v495_v61 = vld [vmem:[%s1275_s15 + $0x28] sm:$0x3f] }
  0x2a   : >> { %v739_v36 = vld [vmem:[%s1275_s15 + $0x18] sm:$0x3f]  ;;  %v284_v38 = vsel %vm283_vm0, %v275_v30, 0.0  ;;  %v291_v39 = vsel %vm283_vm0, %v276_v31, 0.0  ;;  %v278_v41 = vmul.f32 %v270_v35, %v1326_v40  ;;  %v271_v52 = vld [vmem:[%s1275_s15 + $0x20] sm:$0x3f] }
  0x2b   : >> { %v616_v37 = vld [vmem:[%s1275_s15 + $0x18] sm:$0x3f]  ;;  %v285_v42 = vrot.slane %v284_v38, 4  ;;  %v292_v43 = vrot.slane %v291_v39, 4  ;;  %v298_v44 = vsel %vm283_vm0, %v277_v34, 0.0  ;;  %v279_v55 = vmul.f32 %v271_v52, %v1338_v51  ;;  %s363_s26 = smul.u32 40, %s1173_s7 }
  0x2c   : >> { %631 = vrot.lane.b32.xlu1 %v614_v16, %s1177_s20  ;;  %v299_v47 = vrot.slane %v298_v44, 4  ;;  %v305_v48 = vsel %vm283_vm0, %v278_v41, 0.0  ;;  %v740_v53 = vld [vmem:[%s1275_s15 + $0x20] sm:$0x3f]  ;;  %v372_v62 = vld [vmem:[%s1275_s15 + $0x28] sm:$0x3f] }
  0x2d   : >> { %629 = vrot.lane.b32.xlu0 %v613_v17, %s1177_s20  ;;  %v286_v49 = vadd.f32 %v285_v42, %v284_v38  ;;  %v293_v50 = vadd.f32 %v292_v43, %v291_v39  ;;  %v617_v54 = vld [vmem:[%s1275_s15 + $0x20] sm:$0x3f]  ;;  %v306_v56 = vrot.slane %v305_v48, 4  ;;  %v312_v58 = vsel %vm283_vm0, %v279_v55, 0.0  ;;  %v741_v4 = vld [vmem:[%s1275_s15 + $0x28] sm:$0x3f]  ;;  %s1398_s27 = scalar_lea.vmem %s135_s6, %s363_s26 [#allocation4] }
  0x2e   : >> { %v300_v57 = vadd.f32 %v299_v47, %v298_v44  ;;  %v313_v63 = vrot.slane %v312_v58, 4  ;;  %v618_v5 = vld [vmem:[%s1275_s15 + $0x28] sm:$0x3f]  ;;  %v496_v14 = vld [vmem:[%s1275_s15 + $0x30] sm:$0x3f]  ;;  %vm350_vm2 = vcmask 1042434  }
  0x2f   : >> { %v287_v59 = vrot.slane %v286_v49, 2  ;;  %v294_v60 = vrot.slane %v293_v50, 2  ;;  %v307_v0 = vadd.f32 %v306_v56, %v305_v48  ;;  %v1354_v9 = vld [vmem:[%s1263_s30 + $0x28] sm:$0x3f]  ;;  %v373_v15 = vld [vmem:[%s1275_s15 + $0x30] sm:$0x3f] }
  0x30   : >> { %754 = vrot.lane.b32.xlu1 %v737_v18, %s1178_s25  ;;  %v301_v1 = vrot.slane %v300_v57, 2  ;;  %v314_v6 = vadd.f32 %v313_v63, %v312_v58  ;;  %v272_v10 = vld [vmem:[%s1275_s15 + $0x28] sm:$0x3f]  ;;  %v619_v24 = vld [vmem:[%s1275_s15 + $0x30] sm:$0x3f]  ;;  %vm352_vm3 = vcmask 1043459  }
  0x31   : >> { %752 = vrot.lane.b32.xlu0 %v736_v19, %s1178_s25  ;;  %v288_v2 = vadd.f32 %v287_v59, %v286_v49  ;;  %v295_v3 = vadd.f32 %v294_v60, %v293_v50  ;;  %v308_v7 = vrot.slane %v307_v0, 2  ;;  %v280_v13 = vmul.f32 %v272_v10, %v1354_v9  ;;  %v1368_v32 = vld [vmem:[%s1263_s30 + $0x30] sm:$0x3f]  ;;  %v374_v38 = vld [vmem:[%s1275_s15 + $0x38] sm:$0x3f]  ;;  %s256_s7 = sadd.s32 1, %s1173_s7  }
  0x32   : >> { %v302_v8 = vadd.f32 %v301_v1, %v300_v57  ;;  %v315_v16 = vrot.slane %v314_v6, 2  ;;  %v273_v34 = vld [vmem:[%s1275_s15 + $0x30] sm:$0x3f]  ;;  %v1379_v44 = vld [vmem:[%s1263_s30 + $0x38] sm:$0x3f]  ;;  %vm354_vm4 = vcmask 1044484  }
  0x33   : >> { %v289_v11 = vrot.slane %v288_v2, 1  ;;  %v296_v12 = vrot.slane %v295_v3, 1  ;;  %v309_v17 = vadd.f32 %v308_v7, %v307_v0  ;;  %v319_v18 = vsel %vm283_vm0, %v280_v13, 0.0  ;;  %v743_v50 = vld [vmem:[%s1275_s15 + $0x38] sm:$0x3f]  ;;  %p253_p12 = scmp.ge.s32.totalorder %s256_s7, 5  }
  0x34   : >> { %510 = vrot.lane.b32.xlu1 %v492_v20, %s1175_s16  ;;  %v303_v19 = vrot.slane %v302_v8, 1  ;;  %v320_v20 = vrot.slane %v319_v18, 4  ;;  %v316_v25 = vadd.f32 %v315_v16, %v314_v6  ;;  %v620_v52 = vld [vmem:[%s1275_s15 + $0x38] sm:$0x3f]  ;;  %vm356_vm5 = vcmask 1045509   ;;  %s1015_s28 = smul.u32 (%p253_p12), 3200, %s1161_s12 }
  0x35   : >> { %387 = vrot.lane.b32.xlu0 %v369_v21, %s1176_s18  ;;  %v290_v21 = vadd.f32 %v289_v11, %v288_v2  ;;  %vm358_vm6 = vcmask 1046534   ;;  %vm360_vm7 = vcmask 1047559   ;;  %vm365_vm8 = vcmask 64512   ;;  %s874_s29 = sshll.u32 (%p253_p12), %s135_s6, 4  ;;  %s1537_s7 = scalar_lea.sflag (%p253_p12), [#allocation5], %s133_s23  ;;  %s1533_s29 = int_to_ptr.vmem [resolvable:$true] %s874_s29 }
  0x36   : >> { %v304_v30 = vadd.f32 %v303_v19, %v302_v8  ;;  %v317_v39 = vrot.slane %v316_v25, 1  ;;  %s1531_s5 = scalar_lea.hbm (%p253_p12), %s1585_s2, %s1015_s28  ;;  %s1085_s30 = scalar_lea.vmem (%p253_p12), %s1533_s29, 3200 }
  0x37   : > { %p1086_p13 = scmp.ne.s32.totalorder (%p253_p12), %s1533_s29, %s1085_s30  ;;  %s1179_s12 = smov (%p253_p12), [#allocation4]  }
  0x38   : >> { %756 = vrot.lane.b32.xlu1 %v738_v22, %s1178_s25  ;;  %v297_v22 = vadd.f32 %v296_v12, %v295_v3  ;;  %s1089_s24 = sshll.u32 (%p253_p12), %s1179_s12, 4  ;;  %s1090_s24 = int_to_ptr.vmem [resolvable:$false] %s1089_s24 }
  0x39   : >> { %633 = vrot.lane.b32.xlu0 %v615_v23, %s1177_s20  ;;  %v742_v23 = vld [vmem:[%s1275_s15 + $0x30] sm:$0x3f]  ;;  %p1087_p0 = pnand (%p253_p12), %p1086_p13, %p1237_p4  ;;  %s1091_s6 = scalar_lea.vmem (%p253_p12), %s1090_s24, 6400 }
  0x3a   : >> { %v349_v35 = vsel %vm348_vm1, %v297_v22, %v290_v21  ;;  %p1092_p2 = scmp.lt.s32.totalorder (%p253_p12), %s1533_s29, %s1090_s24  ;;  %p1093_p3 = scmp.lt.s32.totalorder (%p253_p12), %s1091_s6, %s1085_s30 }
  0x3b   : > { %p1088_p1 = pneg (%p253_p12), %p1087_p0 }
  0x3c   : >> { %512 = vrot.lane.b32.xlu1 %v493_v28, %s1175_s16  ;;  %v321_v28 = vadd.f32 %v320_v20, %v319_v18  ;;  %p1094_p5 = por (%p253_p12), %p1093_p3, %p1092_p2 }
  0x3d   : >> { %389 = vrot.lane.b32.xlu0 %v370_v29, %s1176_s18  ;;  %v310_v29 = vrot.slane %v309_v17, 1 }
  0x3e   : >> { %v322_v31 = vrot.slane %v321_v28, 2  ;;  %p1095_p6 = pnand (%p253_p12), %p1094_p5, %p1088_p1 }
  0x3f   : >> { %v311_v42 = vadd.f32 %v310_v29, %v309_v17 }
  0x40   : >> { %758 = vrot.lane.b32.xlu1 %v739_v36, %s1178_s25  ;;  %v281_v36 = vmul.f32 %v273_v34, %v1368_v32  ;;  %v323_v41 = vadd.f32 %v322_v31, %v321_v28 }
  0x41   : >> { %635 = vrot.lane.b32.xlu0 %v616_v37, %s1177_s20  ;;  %v497_v37 = vld [vmem:[%s1275_s15 + $0x38] sm:$0x3f] }
  0x42   : >> { %v326_v43 = vsel %vm283_vm0, %v281_v36, 0.0  ;;  %v324_v49 = vrot.slane %v323_v41, 1 }
  0x43   : >> { %v327_v47 = vrot.slane %v326_v43, 4 }
  0x44   : >> { %514 = vrot.lane.b32.xlu1 %v494_v45, %s1175_s16  ;;  %v274_v45 = vld [vmem:[%s1275_s15 + $0x38] sm:$0x3f]  ;;  %v325_v59 = vadd.f32 %v324_v49, %v323_v41 }
  0x45   : >> { %391 = vrot.lane.b32.xlu0 %v371_v46, %s1176_s18  ;;  %v351_v46 = vsel %vm350_vm2, %v304_v30, %v349_v35  ;;  %v282_v48 = vmul.f32 %v274_v45, %v1379_v44 }
  0x46   : >> { %v353_v56 = vsel %vm352_vm3, %v311_v42, %v351_v46 }
  0x47   : >> { %v333_v55 = vsel %vm283_vm0, %v282_v48, 0.0 }
  0x48   : >> { %760 = vrot.lane.b32.xlu1 %v740_v53, %s1178_s25  ;;  %v318_v53 = vadd.f32 %v317_v39, %v316_v25  ;;  %v334_v57 = vrot.slane %v333_v55, 4 }
  0x49   : >> { %637 = vrot.lane.b32.xlu0 %v617_v54, %s1177_s20  ;;  %v328_v54 = vadd.f32 %v327_v47, %v326_v43 }
  0x4a   : >> { %v335_v60 = vadd.f32 %v334_v57, %v333_v55 }
  0x4b   : >> { %v329_v58 = vrot.slane %v328_v54, 2 }
  0x4c   : >> { %516 = vrot.lane.b32.xlu1 %v495_v61, %s1175_s16  ;;  %v355_v61 = vsel %vm354_vm4, %v318_v53, %v353_v56  ;;  %v336_v63 = vrot.slane %v335_v60, 2 }
  0x4d   : >> { %393 = vrot.lane.b32.xlu0 %v372_v62, %s1176_s18  ;;  %v330_v62 = vadd.f32 %v329_v58, %v328_v54  ;;  %v357_v1 = vsel %vm356_vm5, %v325_v59, %v355_v61 }
  0x4e   : >> { %v337_v2 = vadd.f32 %v336_v63, %v335_v60 }
  0x4f   : >> { %v331_v0 = vrot.slane %v330_v62, 1 }
  0x50   : >> { %762 = vrot.lane.b32.xlu1 %v741_v4, %s1178_s25  ;;  %v338_v4 = vrot.slane %v337_v2, 1 }
  0x51   : >> { %639 = vrot.lane.b32.xlu0 %v618_v5, %s1177_s20  ;;  %v332_v3 = vadd.f32 %v331_v0, %v330_v62 }
  0x52   : >> { %v339_v6 = vadd.f32 %v338_v4, %v337_v2 }
  0x53   : >> { %v359_v5 = vsel %vm358_vm6, %v332_v3, %v357_v1 }
  0x54   : >> { %518 = vrot.lane.b32.xlu1 %v496_v14, %s1175_s16  ;;  %v361_v7 = vsel %vm360_vm7, %v339_v6, %v359_v5 }
  0x55   : >> { %395 = vrot.lane.b32.xlu0 %v373_v15, %s1176_s18  ;;  %366 = vst.msk [vmem:[%s1398_s27] sm:$0xff] %vm365_vm8, %v361_v7 }
  0x58   : >> { %764 = vrot.lane.b32.xlu1 %v742_v23, %s1178_s25 }
  0x59   : >> { %641 = vrot.lane.b32.xlu0 %v619_v24, %s1177_s20 }
  0x5c   : >> { %520 = vrot.lane.b32.xlu1 %v497_v37, %s1175_s16 }
  0x5d   : >> { %397 = vrot.lane.b32.xlu0 %v374_v38, %s1176_s18 }
  0x60   : >> { %766 = vrot.lane.b32.xlu1 %v743_v50, %s1178_s25 }
  0x61   : >> { %643 = vrot.lane.b32.xlu0 %v620_v52, %s1177_s20 }
  0x96   : >> { %v507_v8 = vpop.permute.xlu1 %506 }
  0x97   : >> { %v384_v10 = vpop.permute.xlu0 %383  ;;  %v530_v11 = vmul.f32 %v507_v8, %v1304_v26 }
  0x98   : >> { %v407_v12 = vmul.f32 %v384_v10, %v1304_v26 }
  0x99   : >> { %v538_v13 = vsel %vm283_vm0, %v530_v11, 0.0 }
  0x9a   : >> { %v509_v14 = vpop.permute.xlu1 %508  ;;  %v415_v16 = vsel %vm283_vm0, %v407_v12, 0.0  ;;  %v539_v19 = vrot.slane %v538_v13, 4 }
  0x9b   : >> { %v386_v15 = vpop.permute.xlu0 %385  ;;  %v531_v17 = vmul.f32 %v509_v14, %v1307_v27  ;;  %v416_v22 = vrot.slane %v415_v16, 4 }
  0x9c   : >> { %v408_v18 = vmul.f32 %v386_v15, %v1307_v27  ;;  %v540_v30 = vadd.f32 %v539_v19, %v538_v13 }
  0x9d   : >> { %v545_v20 = vsel %vm283_vm0, %v531_v17, 0.0  ;;  %v417_v36 = vadd.f32 %v416_v22, %v415_v16 }
  0x9e   : >> { %v422_v21 = vsel %vm283_vm0, %v408_v18, 0.0  ;;  %v546_v23 = vrot.slane %v545_v20, 4  ;;  %v632_v24 = vpop.permute.xlu1 %631  ;;  %v541_v46 = vrot.slane %v540_v30, 2 }
  0x9f   : >> { %v630_v25 = vpop.permute.xlu0 %629  ;;  %v654_v28 = vmul.f32 %v632_v24, %v1307_v27  ;;  %v423_v31 = vrot.slane %v422_v21, 4  ;;  %v418_v53 = vrot.slane %v417_v36, 2 }
  0xa0   : >> { %v653_v29 = vmul.f32 %v630_v25, %v1304_v26  ;;  %v547_v37 = vadd.f32 %v546_v23, %v545_v20  ;;  %v542_v60 = vadd.f32 %v541_v46, %v540_v30 }
  0xa1   : >> { %v668_v34 = vsel %vm283_vm0, %v654_v28, 0.0  ;;  %v424_v47 = vadd.f32 %v423_v31, %v422_v21  ;;  %v419_v1 = vadd.f32 %v418_v53, %v417_v36 }
  0xa2   : >> { %v661_v35 = vsel %vm283_vm0, %v653_v29, 0.0  ;;  %v755_v38 = vpop.permute.xlu1 %754  ;;  %v669_v41 = vrot.slane %v668_v34, 4  ;;  %v548_v54 = vrot.slane %v547_v37, 2  ;;  %v543_v10 = vrot.slane %v542_v60, 1 }
  0xa3   : >> { %v753_v39 = vpop.permute.xlu0 %752  ;;  %v662_v42 = vrot.slane %v661_v35, 4  ;;  %v777_v43 = vmul.f32 %v755_v38, %v1307_v27  ;;  %v420_v16 = vrot.slane %v419_v1, 1 }
  0xa4   : >> { %v776_v45 = vmul.f32 %v753_v39, %v1304_v26  ;;  %v670_v48 = vadd.f32 %v669_v41, %v668_v34  ;;  %v425_v26 = vrot.slane %v424_v47, 2  ;;  %v549_v2 = vadd.f32 %v548_v54, %v547_v37 }
  0xa5   : >> { %v663_v49 = vadd.f32 %v662_v42, %v661_v35  ;;  %v791_v50 = vsel %vm283_vm0, %v777_v43, 0.0  ;;  %v544_v25 = vadd.f32 %v543_v10, %v542_v60  ;;  %v421_v36 = vadd.f32 %v420_v16, %v419_v1 }
  0xa6   : >> { %v784_v52 = vsel %vm283_vm0, %v776_v45, 0.0  ;;  %v792_v55 = vrot.slane %v791_v50, 4  ;;  %v511_v56 = vpop.permute.xlu1 %510  ;;  %v671_v61 = vrot.slane %v670_v48, 2  ;;  %v426_v11 = vadd.f32 %v425_v26, %v424_v47 }
  0xa7   : >> { %v388_v57 = vpop.permute.xlu0 %387  ;;  %v785_v58 = vrot.slane %v784_v52, 4  ;;  %v532_v59 = vmul.f32 %v511_v56, %v1315_v33  ;;  %v664_v62 = vrot.slane %v663_v49, 2  ;;  %v550_v17 = vrot.slane %v549_v2, 1 }
  0xa8   : >> { %v409_v27 = vmul.f32 %v388_v57, %v1315_v33  ;;  %v793_v3 = vadd.f32 %v792_v55, %v791_v50  ;;  %v672_v12 = vadd.f32 %v671_v61, %v670_v48  ;;  %v427_v28 = vrot.slane %v426_v11, 1 }
  0xa9   : >> { %v552_v63 = vsel %vm283_vm0, %v532_v59, 0.0  ;;  %v786_v6 = vadd.f32 %v785_v58, %v784_v52  ;;  %v665_v14 = vadd.f32 %v664_v62, %v663_v49  ;;  %v551_v37 = vadd.f32 %v550_v17, %v549_v2 }
  0xaa   : >> { %v429_v0 = vsel %vm283_vm0, %v409_v27, 0.0  ;;  %v757_v4 = vpop.permute.xlu1 %756  ;;  %v553_v7 = vrot.slane %v552_v63, 4  ;;  %v794_v18 = vrot.slane %v793_v3, 2  ;;  %v673_v29 = vrot.slane %v672_v12, 1 }
  0xab   : >> { %v634_v5 = vpop.permute.xlu0 %633  ;;  %v430_v8 = vrot.slane %v429_v0, 4  ;;  %v778_v13 = vmul.f32 %v757_v4, %v1315_v33  ;;  %v787_v22 = vrot.slane %v786_v6, 2  ;;  %v666_v31 = vrot.slane %v665_v14, 1 }
  0xac   : >> { %v655_v15 = vmul.f32 %v634_v5, %v1315_v33  ;;  %v554_v23 = vadd.f32 %v553_v7, %v552_v63  ;;  %v795_v38 = vadd.f32 %v794_v18, %v793_v3  ;;  %v428_v53 = vadd.f32 %v427_v28, %v426_v11 }
  0xad   : >> { %v798_v19 = vsel %vm283_vm0, %v778_v13, 0.0  ;;  %v431_v24 = vadd.f32 %v430_v8, %v429_v0  ;;  %v788_v43 = vadd.f32 %v787_v22, %v786_v6  ;;  %v674_v54 = vadd.f32 %v673_v29, %v672_v12 }
  0xae   : >> { %v513_v20 = vpop.permute.xlu1 %512  ;;  %v799_v34 = vrot.slane %v798_v19, 4  ;;  %v675_v35 = vsel %vm283_vm0, %v655_v15, 0.0  ;;  %v555_v45 = vrot.slane %v554_v23, 2  ;;  %v667_v55 = vadd.f32 %v666_v31, %v665_v14 }
  0xaf   : >> { %v390_v21 = vpop.permute.xlu0 %389  ;;  %v533_v30 = vmul.f32 %v513_v20, %v1326_v40  ;;  %v432_v46 = vrot.slane %v431_v24, 2  ;;  %v676_v48 = vrot.slane %v675_v35, 4  ;;  %v602_v61 = vsel %vm348_vm1, %v551_v37, %v544_v25 }
  0xb0   : >> { %v410_v33 = vmul.f32 %v390_v21, %v1326_v40  ;;  %v800_v56 = vadd.f32 %v799_v34, %v798_v19  ;;  %v796_v62 = vrot.slane %v795_v38, 1  ;;  %v789_v63 = vrot.slane %v788_v43, 1 }
  0xb1   : >> { %v559_v39 = vsel %vm283_vm0, %v533_v30, 0.0  ;;  %v556_v0 = vadd.f32 %v555_v45, %v554_v23  ;;  %v433_v1 = vadd.f32 %v432_v46, %v431_v24  ;;  %v677_v2 = vadd.f32 %v676_v48, %v675_v35 }
  0xb2   : >> { %v759_v41 = vpop.permute.xlu1 %758  ;;  %v560_v47 = vrot.slane %v559_v39, 4  ;;  %v436_v49 = vsel %vm283_vm0, %v410_v33, 0.0  ;;  %v479_v4 = vsel %vm348_vm1, %v428_v53, %v421_v36  ;;  %v1440_v8 = vsel %vm348_vm1, %v674_v54, %v667_v55 }
  0xb3   : >> { %v636_v42 = vpop.permute.xlu0 %635  ;;  %v779_v50 = vmul.f32 %v759_v41, %v1326_v40  ;;  %v437_v58 = vrot.slane %v436_v49, 4  ;;  %v801_v10 = vrot.slane %v800_v56, 2  ;;  %v797_v15 = vadd.f32 %v796_v62, %v795_v38 }
  0xb4   : >> { %v656_v52 = vmul.f32 %v636_v42, %v1326_v40  ;;  %v561_v57 = vadd.f32 %v560_v47, %v559_v39  ;;  %v790_v19 = vadd.f32 %v789_v63, %v788_v43  ;;  %v557_v20 = vrot.slane %v556_v0, 1 }
  0xb5   : >> { %v805_v59 = vsel %vm283_vm0, %v779_v50, 0.0  ;;  %v438_v40 = vadd.f32 %v437_v58, %v436_v49  ;;  %v434_v21 = vrot.slane %v433_v1, 1  ;;  %v678_v22 = vrot.slane %v677_v2, 2 }
  0xb6   : >> { %v682_v27 = vsel %vm283_vm0, %v656_v52, 0.0  ;;  %v515_v60 = vpop.permute.xlu1 %514  ;;  %v806_v3 = vrot.slane %v805_v59, 4  ;;  %v562_v11 = vrot.slane %v561_v57, 2  ;;  %v802_v29 = vadd.f32 %v801_v10, %v800_v56 }
  0xb7   : >> { %v392_v26 = vpop.permute.xlu0 %391  ;;  %v683_v5 = vrot.slane %v682_v27, 4  ;;  %v534_v6 = vmul.f32 %v515_v60, %v1338_v51  ;;  %v439_v16 = vrot.slane %v438_v40, 2  ;;  %v558_v41 = vadd.f32 %v557_v20, %v556_v0 }
  0xb8   : >> { %v411_v7 = vmul.f32 %v392_v26, %v1338_v51  ;;  %v807_v12 = vadd.f32 %v806_v3, %v805_v59  ;;  %v563_v30 = vadd.f32 %v562_v11, %v561_v57  ;;  %v435_v42 = vadd.f32 %v434_v21, %v433_v1 }
  0xb9   : >> { %v566_v17 = vsel %vm283_vm0, %v534_v6, 0.0  ;;  %v684_v23 = vadd.f32 %v683_v5, %v682_v27  ;;  %v440_v36 = vadd.f32 %v439_v16, %v438_v40  ;;  %v679_v43 = vadd.f32 %v678_v22, %v677_v2 }
  0xba   : >> { %v761_v13 = vpop.permute.xlu1 %760  ;;  %v443_v18 = vsel %vm283_vm0, %v411_v7, 0.0  ;;  %v567_v24 = vrot.slane %v566_v17, 4  ;;  %v808_v31 = vrot.slane %v807_v12, 2  ;;  %v848_v50 = vsel %vm348_vm1, %v797_v15, %v790_v19 }
  0xbb   : >> { %v638_v14 = vpop.permute.xlu0 %637  ;;  %v444_v25 = vrot.slane %v443_v18, 4  ;;  %v780_v28 = vmul.f32 %v761_v13, %v1338_v51  ;;  %v685_v46 = vrot.slane %v684_v23, 2  ;;  %v564_v52 = vrot.slane %v563_v30, 1 }
  0xbc   : >> { %v657_v34 = vmul.f32 %v638_v14, %v1338_v51  ;;  %v568_v37 = vadd.f32 %v567_v24, %v566_v17  ;;  %v803_v51 = vrot.slane %v802_v29, 1  ;;  %v809_v53 = vadd.f32 %v808_v31, %v807_v12 }
  0xbd   : >> { %v445_v38 = vadd.f32 %v444_v25, %v443_v18  ;;  %v812_v39 = vsel %vm283_vm0, %v780_v28, 0.0  ;;  %v441_v56 = vrot.slane %v440_v36, 1  ;;  %v603_v27 = vsel %vm350_vm2, %v558_v41, %v602_v61 }
  0xbe   : >> { %v517_v35 = vpop.permute.xlu1 %516  ;;  %v813_v45 = vrot.slane %v812_v39, 4  ;;  %v569_v47 = vrot.slane %v568_v37, 2  ;;  %v689_v48 = vsel %vm283_vm0, %v657_v34, 0.0  ;;  %v480_v60 = vsel %vm350_vm2, %v435_v42, %v479_v4 }
  0xbf   : >> { %v394_v33 = vpop.permute.xlu0 %393  ;;  %v535_v49 = vmul.f32 %v517_v35, %v1354_v9  ;;  %v446_v57 = vrot.slane %v445_v38, 2  ;;  %v690_v62 = vrot.slane %v689_v48, 4  ;;  %v680_v63 = vrot.slane %v679_v43, 1 }
  0xc0   : >> { %v814_v58 = vadd.f32 %v813_v45, %v812_v39  ;;  %v570_v26 = vadd.f32 %v569_v47, %v568_v37  ;;  %v686_v0 = vadd.f32 %v685_v46, %v684_v23  ;;  %v412_v2 = vmul.f32 %v394_v33, %v1354_v9 }
  0xc1   : >> { %v573_v59 = vsel %vm283_vm0, %v535_v49, 0.0  ;;  %v804_v40 = vadd.f32 %v803_v51, %v802_v29  ;;  %v565_v3 = vadd.f32 %v564_v52, %v563_v30  ;;  %v810_v5 = vrot.slane %v809_v53, 1 }
  0xc2   : >> { %v763_v54 = vpop.permute.xlu1 %762  ;;  %v574_v1 = vrot.slane %v573_v59, 4  ;;  %v442_v11 = vadd.f32 %v441_v56, %v440_v36  ;;  %v447_v12 = vadd.f32 %v446_v57, %v445_v38  ;;  %v815_v13 = vrot.slane %v814_v58, 2 }
  0xc3   : >> { %v640_v55 = vpop.permute.xlu0 %639  ;;  %v781_v6 = vmul.f32 %v763_v54, %v1354_v9  ;;  %v450_v61 = vsel %vm283_vm0, %v412_v2, 0.0  ;;  %v571_v4 = vrot.slane %v570_v26, 1  ;;  %v691_v14 = vadd.f32 %v690_v62, %v689_v48 }
  0xc4   : >> { %v658_v16 = vmul.f32 %v640_v55, %v1354_v9  ;;  %v1458_v17 = vadd.f32 %v680_v63, %v679_v43  ;;  %v687_v18 = vrot.slane %v686_v0, 1  ;;  %v575_v19 = vadd.f32 %v574_v1, %v573_v59 }
  0xc5   : >> { %v819_v15 = vsel %vm283_vm0, %v781_v6, 0.0  ;;  %v451_v20 = vrot.slane %v450_v61, 4  ;;  %v849_v21 = vsel %vm350_vm2, %v804_v40, %v848_v50  ;;  %v604_v22 = vsel %vm352_vm3, %v565_v3, %v603_v27 }
  0xc6   : >> { %v519_v7 = vpop.permute.xlu1 %518  ;;  %v811_v23 = vadd.f32 %v810_v5, %v809_v53  ;;  %v820_v24 = vrot.slane %v819_v15, 4  ;;  %v481_v28 = vsel %vm352_vm3, %v442_v11, %v480_v60  ;;  %v448_v29 = vrot.slane %v447_v12, 1 }
  0xc7   : >> { %v396_v10 = vpop.permute.xlu0 %395  ;;  %v816_v30 = vadd.f32 %v815_v13, %v814_v58  ;;  %v536_v31 = vmul.f32 %v519_v7, %v1368_v32  ;;  %v572_v34 = vadd.f32 %v571_v4, %v570_v26  ;;  %v692_v9 = vrot.slane %v691_v14, 2 }
  0xc8   : >> { %v696_v35 = vsel %vm283_vm0, %v658_v16, 0.0  ;;  %v413_v33 = vmul.f32 %v396_v10, %v1368_v32  ;;  %v1466_v37 = vadd.f32 %v687_v18, %v686_v0  ;;  %v576_v38 = vrot.slane %v575_v19, 2 }
  0xc9   : >> { %v452_v39 = vadd.f32 %v451_v20, %v450_v61  ;;  %v580_v41 = vsel %vm283_vm0, %v536_v31, 0.0  ;;  %v1470_v42 = vsel %vm352_vm3, %v811_v23, %v849_v21  ;;  %v821_v43 = vadd.f32 %v820_v24, %v819_v15 }
  0xca   : >> { %v765_v25 = vpop.permute.xlu1 %764  ;;  %v581_v45 = vrot.slane %v580_v41, 4  ;;  %v457_v46 = vsel %vm283_vm0, %v413_v33, 0.0  ;;  %v449_v48 = vadd.f32 %v448_v29, %v447_v12  ;;  %v817_v49 = vrot.slane %v816_v30, 1 }
  0xcb   : >> { %v642_v36 = vpop.permute.xlu0 %641  ;;  %v697_v50 = vrot.slane %v696_v35, 4  ;;  %v458_v51 = vrot.slane %v457_v46, 4  ;;  %v605_v52 = vsel %vm354_vm4, %v572_v34, %v604_v22  ;;  %v1474_v53 = vadd.f32 %v692_v9, %v691_v14 }
  0xcc   : >> { %v582_v54 = vadd.f32 %v581_v45, %v580_v41  ;;  %v782_v55 = vmul.f32 %v765_v25, %v1368_v32  ;;  %v577_v56 = vadd.f32 %v576_v38, %v575_v19  ;;  %v453_v57 = vrot.slane %v452_v39, 2 }
  0xcd   : >> { %v459_v58 = vadd.f32 %v458_v51, %v457_v46  ;;  %v659_v59 = vmul.f32 %v642_v36, %v1368_v32  ;;  %v822_v27 = vrot.slane %v821_v43, 2  ;;  %v1481_v0 = vsel %vm354_vm4, %v449_v48, %v481_v28 }
  0xce   : >> { %v521_v47 = vpop.permute.xlu1 %520  ;;  %v583_v60 = vrot.slane %v582_v54, 2  ;;  %v826_v26 = vsel %vm283_vm0, %v782_v55, 0.0  ;;  %v698_v1 = vadd.f32 %v697_v50, %v696_v35  ;;  %v818_v3 = vadd.f32 %v817_v49, %v816_v30 }
  0xcf   : >> { %v537_v62 = vmul.f32 %v521_v47, %v1379_v44  ;;  %v398_v63 = vpop.permute.xlu0 %397  ;;  %v460_v2 = vrot.slane %v459_v58, 2  ;;  %v827_v40 = vrot.slane %v826_v26, 4  ;;  %v703_v6 = vsel %vm283_vm0, %v659_v59, 0.0 }
  0xd0   : >> { %v584_v5 = vadd.f32 %v583_v60, %v582_v54  ;;  %v694_v10 = vrot.slane %v1474_v53, 1  ;;  %v578_v11 = vrot.slane %v577_v56, 1  ;;  %v454_v12 = vadd.f32 %v453_v57, %v452_v39 }
  0xd1   : >> { %v587_v7 = vsel %vm283_vm0, %v537_v62, 0.0  ;;  %v828_v13 = vadd.f32 %v827_v40, %v826_v26  ;;  %v823_v61 = vadd.f32 %v822_v27, %v821_v43  ;;  %v704_v4 = vrot.slane %v703_v6, 4 }
  0xd2   : >> { %v767_v32 = vpop.permute.xlu1 %766  ;;  %v588_v14 = vrot.slane %v587_v7, 4  ;;  %v414_v15 = vmul.f32 %v398_v63, %v1379_v44  ;;  %v699_v16 = vrot.slane %v698_v1, 2  ;;  %v461_v18 = vadd.f32 %v460_v2, %v459_v58 }
  0xd3   : >> { %v829_v19 = vrot.slane %v828_v13, 2  ;;  %v783_v20 = vmul.f32 %v767_v32, %v1379_v44  ;;  %v585_v21 = vrot.slane %v584_v5, 1  ;;  %v705_v22 = vadd.f32 %v704_v4, %v703_v6  ;;  %v644_v25 = vpop.permute.xlu0 %643 }
  0xd4   : >> { %v589_v23 = vadd.f32 %v588_v14, %v587_v7  ;;  %v464_v24 = vsel %vm283_vm0, %v414_v15, 0.0  ;;  %v579_v28 = vadd.f32 %v578_v11, %v577_v56  ;;  %v455_v34 = vrot.slane %v454_v12, 1 }
  0xd5   : >> { %v830_v29 = vadd.f32 %v829_v19, %v828_v13  ;;  %v465_v30 = vrot.slane %v464_v24, 4  ;;  %v833_v31 = vsel %vm283_vm0, %v783_v20, 0.0  ;;  %v706_v9 = vrot.slane %v705_v22, 2 }
  0xd6   : >> { %v590_v35 = vrot.slane %v589_v23, 2  ;;  %v834_v33 = vrot.slane %v833_v31, 4  ;;  %v824_v36 = vrot.slane %v823_v61, 1  ;;  %v700_v38 = vadd.f32 %v699_v16, %v698_v1 }
  0xd7   : >> { %v466_v39 = vadd.f32 %v465_v30, %v464_v24  ;;  %v660_v41 = vmul.f32 %v644_v25, %v1379_v44  ;;  %v586_v43 = vadd.f32 %v585_v21, %v584_v5  ;;  %v462_v45 = vrot.slane %v461_v18, 1 }
  0xd8   : >> { %v591_v46 = vadd.f32 %v590_v35, %v589_v23  ;;  %v835_v47 = vadd.f32 %v834_v33, %v833_v31  ;;  %v831_v48 = vrot.slane %v830_v29, 1  ;;  %v707_v49 = vadd.f32 %v706_v9, %v705_v22 }
  0xd9   : >> { %v467_v50 = vrot.slane %v466_v39, 2  ;;  %v710_v51 = vsel %vm283_vm0, %v660_v41, 0.0  ;;  %v606_v54 = vsel %vm356_vm5, %v579_v28, %v605_v52  ;;  %v456_v58 = vadd.f32 %v455_v34, %v454_v12 }
  0xda   : >> { %v592_v55 = vrot.slane %v591_v46, 1  ;;  %v836_v56 = vrot.slane %v835_v47, 2  ;;  %v711_v57 = vrot.slane %v710_v51, 4  ;;  %v825_v59 = vadd.f32 %v824_v36, %v823_v61 }
  0xdb   : >> { %v701_v27 = vrot.slane %v700_v38, 1  ;;  %v468_v60 = vadd.f32 %v467_v50, %v466_v39  ;;  %v463_v44 = vadd.f32 %v462_v45, %v461_v18  ;;  %v607_v1 = vsel %vm358_vm6, %v586_v43, %v606_v54 }
  0xdc   : >> { %v593_v26 = vadd.f32 %v592_v55, %v591_v46  ;;  %v837_v62 = vadd.f32 %v836_v56, %v835_v47  ;;  %v712_v63 = vadd.f32 %v711_v57, %v710_v51  ;;  %v832_v2 = vadd.f32 %v831_v48, %v830_v29 }
  0xdd   : >> { %v708_v40 = vrot.slane %v707_v49, 1  ;;  %v469_v5 = vrot.slane %v468_v60, 1  ;;  %v851_v52 = vsel %vm354_vm4, %v818_v3, %v1470_v42  ;;  %v695_v11 = vadd.f32 %v694_v10, %v1474_v53 }
  0xde   : >> { %v608_v6 = vsel %vm360_vm7, %v593_v26, %v607_v1  ;;  %v838_v7 = vrot.slane %v837_v62, 1  ;;  %v713_v32 = vrot.slane %v712_v63, 2  ;;  %v483_v12 = vsel %vm356_vm5, %v456_v58, %v1481_v0 }
  0xdf   : >> { %v852_v13 = vsel %vm356_vm5, %v825_v59, %v851_v52  ;;  %1006 = vst.msk [vmem:[%s1398_s27 + $0x10] sm:$0xff] %vm365_vm8, %v608_v6  ;;  %v470_v61 = vadd.f32 %v469_v5, %v468_v60  ;;  %v702_v4 = vadd.f32 %v701_v27, %v700_v38  ;;  %v484_v14 = vsel %vm358_vm6, %v463_v44, %v483_v12 }
  0xe0   : >> { %v839_v42 = vadd.f32 %v838_v7, %v837_v62  ;;  %v714_v3 = vadd.f32 %v713_v32, %v712_v63  ;;  %v726_v15 = vsel %vm350_vm2, %v1458_v17, %v1440_v8  ;;  %v853_v53 = vsel %vm358_vm6, %v832_v2, %v852_v13 }
  0xe1   : >> { %v709_v10 = vadd.f32 %v708_v40, %v707_v49  ;;  %v485_v0 = vsel %vm360_vm7, %v470_v61, %v484_v14  ;;  %v727_v16 = vsel %vm352_vm3, %v1466_v37, %v726_v15  ;;  %255 = sbr.rel (!%p253_p12) target bundleno = 32 (0x20), region = 124 }
  0xe2   : >> { %1005 = vst.msk [vmem:[%s1398_s27 + $0x8] sm:$0xff] %vm365_vm8, %v485_v0  ;;  %v854_v18 = vsel %vm360_vm7, %v839_v42, %v853_v53  ;;  %v715_v19 = vrot.slane %v714_v3, 1  ;;  %v728_v20 = vsel %vm354_vm4, %v695_v11, %v727_v16 }
  0xe3   : >> { %1008 = vst.msk [vmem:[%s1398_s27 + $0x20] sm:$0xff] %vm365_vm8, %v854_v18  ;;  %v729_v21 = vsel %vm356_vm5, %v702_v4, %v728_v20 }
  0xe4   : >> { %v716_v8 = vadd.f32 %v715_v19, %v714_v3  ;;  %v730_v17 = vsel %vm358_vm6, %v709_v10, %v729_v21 }
  0xe6   : >> { %v731_v22 = vsel %vm360_vm7, %v716_v8, %v730_v17 }
  0xe7   : >> { %1007 = vst.msk [vmem:[%s1398_s27 + $0x18] sm:$0xff] %vm365_vm8, %v731_v22 }
  0xe8   : > { %1098 = shalt.err (!%p1095_p6)
}
  0xe9   : > { %s1099_s23 = scalar_lea.hbm %s1531_s5, 3200  ;;  %s1103_s16 = scalar_lea.hbm %s1585_s2, 6400 }
  0xea   : > { %p1100_p7 = scmp.ne.s32.totalorder %s1531_s5, %s1099_s23  ;;  %p1104_p11 = scmp.lt.u32.totalorder %s1531_s5, %s1585_s2 }
  0xeb   : > { %p1105_p12 = scmp.lt.u32.totalorder %s1103_s16, %s1099_s23  ;;  %p1107_p0 = scmp.lt.u32.totalorder %s1099_s23, %s1531_s5 }
  0xec   : > { %p1101_p9 = pnand %p1100_p7, %p1237_p4 }
  0xed   : > { %p1106_p13 = por %p1105_p12, %p1104_p11 }
  0xee   : > { %p1102_p10 = pneg %p1101_p9 }
  0xef   : > { %p1108_p1 = por %p1107_p0, %p1106_p13 }
  0xf1   : > { %p1109_p2 = pnand %p1108_p1, %p1102_p10 }
  0xf3   : > { %1112 = shalt.err (!%p1109_p2)
}
  0xf4   : > { %s1180_s25 = smov 128   ;;  %s1181_s26 = smov 8  }
  0xf5   : > { %1016 = dma.vmem_to_hbm [thread:$0]  (%p1237_p4), %s1533_s29, 3200, %s1531_s5, %s1537_s7, %s1180_s25, %s1180_s25, %s1181_s26  }
  0xf6 PF: > { %p1022_p3 = scmp.ge.s32.totalorder %s1169_s14, 2  ;;  %s889_s27 = sand.u32 1, %s1149_s9  }
  0xf7   : > { %s890_s28 = scalar_lea.sflag [#allocation5], %s889_s27 }
  0xf8   : > { %p1019_p5 = pnand %p1022_p3, %p1244_p8 }
  0xfa   : > { %1144 = dma.done.wait (!%p1019_p5), %s890_s28, 3200  }
  0xfb   : > { %1146 = vsyncadd (!%p1019_p5), %s890_s28, 4294964096  ;;  %s15_s14 = sadd.s32 1, %s1169_s14   ;;  %s1588_s9 = smov %s1153_s10 }
  0xfc   : > { %p12_p6 = scmp.ge.s32.totalorder %s15_s14, 4   ;;  %s1589_s10 = smov %s1157_s11 }
  0xfd   : > { %s1590_s11 = smov %s1250_s22  ;;  %s1591_s12 = smov %s1165_s13 }
  0xfe   : > { %s1592_s13 = smov %s1594_s17  ;;  %14 = sbr.rel (!%p12_p6) target bundleno = 4 (0x4), region = 135 }
 0x105   :  { %895 = vsyncpa [#allocation5], 1 }
 0x106   :  { %897 = vsyncpa [#allocation5 + $0x1], 1 }
 0x107   :  { %898 = vsyncmov [#allocation3] }
 0x10a   :  { %s899_s19 = vpop.sfrf %898 }
 0x10b   :  { %p1012_p4 = scmp.ne.s32.totalorder %s899_s19, 0 }
 0x10d   :  { %903 = shalt.err (%p1012_p4)  }

</bundles_post_ra>
